<compile_context>
chip_gen: v7x
topology: tpu7x:2x2x1
jax: 0.10.0
libtpu: 0.0.40
codegen_flags: <defaults>
</compile_context>

<pallas_src>
import jax
import jax.numpy as jnp
from jax.experimental import pallas as pl
from jax.experimental.pallas import tpu as pltpu


def _round_up(x, m):
    return (x + m - 1) // m * m


def _attention_loss_kernel(coor_ref, labels_ref, w_ref, out_ref):
    # coor_ref, labels_ref: (TM, D) VMEM tiles; w_ref: (TM, 1) VMEM tile.
    # out_ref: (1, 1) f32 in SMEM, resident across the whole grid (accumulator).
    @pl.when(pl.program_id(0) == 0)
    def _init():
        out_ref[0, 0] = jnp.float32(0.0)

    diff = jnp.abs(coor_ref[...].astype(jnp.float32)
                   - labels_ref[...].astype(jnp.float32))
    # Fused weighted L1: broadcast (TM,1) weights along lanes, single full
    # reduction to a scalar (one reduce pass instead of two).
    weighted = w_ref[...] * diff
    out_ref[0, 0] += jnp.sum(weighted)


def attention_loss(coormeanAngles, labelsAngles, attention, *, max_block_rows=512):
    topN, D = coormeanAngles.shape
    assert attention.shape[0] >= topN, "top-k requires len(attention) >= topN"

    # Glue: torch.topk(attention, topN) — values sorted descending, so
    # topkP[i] == attention[indexs[i]]; the indices themselves are not needed.
    topkP, _ = jax.lax.top_k(attention, topN)
    w = topkP.astype(jnp.float32).reshape(topN, 1)

    # Row tile: multiple of 8 sublanes, capped so 2 inputs x 2 pipeline buffers
    # x (TM, D) f32 stay comfortably inside scoped VMEM on every chip
    # (halve max_block_rows if D is large on v7x's 64 MiB VMEM).
    tm = min(_round_up(topN, 8), max_block_rows)
    topN_pad = _round_up(topN, tm)
    if topN_pad != topN:
        pad = topN_pad - topN
        coormeanAngles = jnp.pad(coormeanAngles, ((0, pad), (0, 0)))
        labelsAngles = jnp.pad(labelsAngles, ((0, pad), (0, 0)))
        w = jnp.pad(w, ((0, pad), (0, 0)))  # zero weight -> zero contribution

    grid = (topN_pad // tm,)
    out = pl.pallas_call(
        _attention_loss_kernel,
        out_shape=jax.ShapeDtypeStruct((1, 1), jnp.float32),
        grid=grid,
        in_specs=[
            pl.BlockSpec((tm, D), lambda i: (i, 0)),
            pl.BlockSpec((tm, D), lambda i: (i, 0)),
            pl.BlockSpec((tm, 1), lambda i: (i, 0)),
        ],
        # Scalar reduction result lives in SMEM (canonical path for scalar
        # outputs; avoids masked 1-lane VMEM stores).
        out_specs=pl.BlockSpec(memory_space=pltpu.MemorySpace.SMEM),
        compiler_params=pltpu.CompilerParams(
            dimension_semantics=("arbitrary",)),  # grid axis is a reduction
    )(coormeanAngles, labelsAngles, w)
    return out[0, 0]


def _reference(coormeanAngles, labelsAngles, attention):
    topN = coormeanAngles.shape[0]
    topkP, _ = jax.lax.top_k(attention, topN)
    per_row = jnp.sum(jnp.abs(coormeanAngles - labelsAngles), axis=1)
    return jnp.sum(topkP * per_row)


if __name__ == "__main__":
    key = jax.random.PRNGKey(0)
    k1, k2, k3 = jax.random.split(key, 3)

    topN, D, M = 8, 32, 16          # small shapes consistent with the forward
    coormeanAngles = jax.random.normal(k1, (topN, D), dtype=jnp.float32)
    labelsAngles = jax.random.normal(k2, (topN, D), dtype=jnp.float32)
    attention = jax.random.uniform(k3, (M,), dtype=jnp.float32)

    loss = attention_loss(coormeanAngles, labelsAngles, attention)
    loss = jax.block_until_ready(loss)

    ref = _reference(coormeanAngles, labelsAngles, attention)
    assert jnp.allclose(loss, ref, rtol=1e-5, atol=1e-5), (loss, ref)

    # Also exercise a non-multiple-of-tile / multi-step-grid case.
    topN2, D2, M2 = 37, 32, 64
    c2 = jax.random.normal(k1, (topN2, D2), dtype=jnp.float32)
    l2 = jax.random.normal(k2, (topN2, D2), dtype=jnp.float32)
    a2 = jax.random.uniform(k3, (M2,), dtype=jnp.float32)
    loss2 = jax.block_until_ready(attention_loss(c2, l2, a2, max_block_rows=16))
    ref2 = _reference(c2, l2, a2)
    assert jnp.allclose(loss2, ref2, rtol=1e-5, atol=1e-5), (loss2, ref2)

    print("KERNEL_OK")
</pallas_src>

<mosaic_0001>
module attributes {stable_mosaic.version = 11 : i64} {
  func.func @_attention_loss_kernel(%arg0: i32, %arg1: memref<8x32xf32, #tpu.memory_space<vmem>>, %arg2: memref<8x32xf32, #tpu.memory_space<vmem>>, %arg3: memref<8x1xf32, #tpu.memory_space<vmem>>, %arg4: memref<1x1xf32, #tpu.memory_space<smem>>) attributes {dimension_semantics = [#tpu.dimension_semantics<arbitrary>], iteration_bounds = array<i64: 1>, scalar_prefetch = 0 : i64, scratch_operands = 0 : i64, tpu.core_type = #tpu.core_type<tc>, window_params = [{transform_indices = @transform_0, window_bounds = array<i64: 8, 32>}, {transform_indices = @transform_1, window_bounds = array<i64: 8, 32>}, {transform_indices = @transform_2, window_bounds = array<i64: 8, 1>}, {transform_indices = @transform_3, window_bounds = array<i64: 1, 1>}]} {
    %c0_i32 = arith.constant 0 : i32
    %0 = arith.cmpi eq, %arg0, %c0_i32 : i32
    %1 = arith.extui %0 : i1 to i32
    %c0_i32_0 = arith.constant 0 : i32
    %2 = arith.cmpi ne, %1, %c0_i32_0 : i32
    scf.if %2 {
      %cst_10 = arith.constant 0.000000e+00 : f32
      %c0_11 = arith.constant 0 : index
      %c0_12 = arith.constant 0 : index
      %17 = memref.load %arg4[%c0_11, %c0_12] : memref<1x1xf32, #tpu.memory_space<smem>>
      memref.store %cst_10, %arg4[%c0_11, %c0_12] : memref<1x1xf32, #tpu.memory_space<smem>>
    } else {
    }
    %c0 = arith.constant 0 : index
    %c0_1 = arith.constant 0 : index
    %3 = vector.load %arg1[%c0, %c0_1] : memref<8x32xf32, #tpu.memory_space<vmem>>, vector<8x32xf32>
    %c0_2 = arith.constant 0 : index
    %c0_3 = arith.constant 0 : index
    %4 = vector.load %arg2[%c0_2, %c0_3] : memref<8x32xf32, #tpu.memory_space<vmem>>, vector<8x32xf32>
    %5 = arith.subf %3, %4 : vector<8x32xf32>
    %6 = math.absf %5 : vector<8x32xf32>
    %c0_4 = arith.constant 0 : index
    %c0_5 = arith.constant 0 : index
    %7 = vector.load %arg3[%c0_4, %c0_5] : memref<8x1xf32, #tpu.memory_space<vmem>>, vector<8x1xf32>
    %8 = vector.broadcast %7 : vector<8x1xf32> to vector<8x32xf32>
    %9 = arith.mulf %8, %6 : vector<8x32xf32>
    %c0_6 = arith.constant 0 : index
    %c0_7 = arith.constant 0 : index
    %10 = memref.load %arg4[%c0_6, %c0_7] : memref<1x1xf32, #tpu.memory_space<smem>>
    %11 = vector.shape_cast %9 : vector<8x32xf32> to vector<1x8x32xf32>
    %cst = arith.constant dense<0.000000e+00> : vector<1xf32>
    %12 = vector.multi_reduction <add>, %11, %cst [1, 2] : vector<1x8x32xf32> to vector<1xf32>
    %13 = vector.shape_cast %12 : vector<1xf32> to vector<1x1x1xf32>
    %14 = vector.extract %13[0, 0, 0] : f32 from vector<1x1x1xf32>
    %15 = arith.addf %10, %14 : f32
    %c0_8 = arith.constant 0 : index
    %c0_9 = arith.constant 0 : index
    %16 = memref.load %arg4[%c0_8, %c0_9] : memref<1x1xf32, #tpu.memory_space<smem>>
    memref.store %15, %arg4[%c0_8, %c0_9] : memref<1x1xf32, #tpu.memory_space<smem>>
    return
  }
  func.func @transform_0(%arg0: i32) -> (i32, i32) {
    %c0_i32 = arith.constant 0 : i32
    %c0_i32_0 = arith.constant 0 : i32
    return %arg0, %c0_i32 : i32, i32
  }
  func.func @transform_1(%arg0: i32) -> (i32, i32) {
    %c0_i32 = arith.constant 0 : i32
    %c0_i32_0 = arith.constant 0 : i32
    return %arg0, %c0_i32 : i32, i32
  }
  func.func @transform_2(%arg0: i32) -> (i32, i32) {
    %c0_i32 = arith.constant 0 : i32
    %c0_i32_0 = arith.constant 0 : i32
    return %arg0, %c0_i32 : i32, i32
  }
  func.func @transform_3(%arg0: i32) -> (i32, i32) {
    %c0_i32 = arith.constant 0 : i32
    %c0_i32_0 = arith.constant 0 : i32
    %c0_i32_1 = arith.constant 0 : i32
    return %c0_i32, %c0_i32_0 : i32, i32
  }
}

</mosaic_0001>

<bundles_post_ra>
// kernel: tpu_custom_call.1
= control target key start
LH: loop header
LB: loop body
LE: loop exit
PB: predicated region body
PF: predicated region fallthrough
CT: control target
= control target key end

     0   :  { %8 = vsyncpa [#allocation3], 0  ;;  %s169_s0 = inlined_call_operand.vmem [shape: f32[8,32], index: 0, kind: input, shape index: {}]   ;;  %s170_s1 = inlined_call_operand.hbm [shape: f32[8,32], index: 1, kind: input, shape index: {}]   ;;  %s171_s2 = inlined_call_operand.vmem [shape: f32[8,1], index: 2, kind: input, shape index: {}]   ;;  %s172_s3 = inlined_call_operand.hbm [shape: f32[1,1], index: 3, kind: output, shape index: {}]  }
   0x1   :  { %9 = vsyncpa [#allocation4], 0  ;;  %s116_s12 = smov [#allocation2]   ;;  %s80_s16 = scalar_lea.hbm %s170_s1, 128 }
   0x2   :  { %s18_s13 = sshll.u32 %s116_s12, 4  ;;  %p81_p0 = scmp.ne.s32.totalorder %s170_s1, %s80_s16  ;;  %s19_s13 = int_to_ptr.vmem [resolvable:$true] %s18_s13 }
   0x3   :  { %p84_p1 = scmp.lt.u32.totalorder %s80_s16, %s170_s1 }
   0x5   :  { %p86_p2 = pnand %p84_p1, %p81_p0 }
   0x7   :  { %89 = shalt.err (!%p86_p2)
}
   0x8   :  { %s90_s21 = scalar_lea.vmem %s19_s13, 128  ;;  %p95_p4 = scmp.lt.s32.totalorder %s19_s13, %s19_s13 }
   0x9   :  { %p91_p3 = scmp.ne.s32.totalorder %s19_s13, %s90_s21  ;;  %p96_p5 = scmp.lt.s32.totalorder %s90_s21, %s90_s21 }
   0xb   :  { %p97_p6 = por %p96_p5, %p95_p4 }
   0xd   :  { %p98_p7 = pnand %p97_p6, %p91_p3 }
   0xf   :  { %101 = shalt.err (!%p98_p7)
}
  0x10   :  { %21 = dma.hbm_to_vmem [thread:$0]  %s170_s1, 128, %s19_s13, [#allocation3]  }
  0x11   :  { %112 = dma.done.wait [#allocation3], 128  }
  0x12   :  { %113 = vsyncadd [#allocation3], 4294967168  ;;  %v117_v0 = vmov 0   ;;  %v37_v1 = vld [vmem:[%s171_s2] sm:$0xff]  ;;  %vm45_vm0 = vcmask 261120   ;;  %s102_s28 = scalar_lea.hbm %s172_s3, 16 }
  0x13   :  { %79 = vset.pattern.permute.xlu0 %v117_v0  ;;  %v33_v2 = vld [vmem:[%s169_s0] sm:$0xff]  ;;  %p103_p8 = scmp.ne.s32.totalorder %s172_s3, %s102_s28  ;;  %p106_p9 = scmp.lt.u32.totalorder %s102_s28, %s172_s3 }
  0x14   :  { %40 = vperm.xlu0 %79, %v37_v1   ;;  %v34_v3 = vld [vmem:[#allocation2] sm:$0xff] }
  0x15   :  { %v35_v4 = vsub.f32 %v33_v2, %v34_v3  ;;  %p108_p10 = pnand %p106_p9, %p103_p8 }
  0x17   :  { %v36_v5 = vand.u32 2147483647, %v35_v4 }
  0x93   :  { %v41_v6 = vpop.permute.xlu0 %40 }
  0x94   :  { %v43_v7 = vmul.f32 %v41_v6, %v36_v5 }
  0x96   :  { %v46_v8 = vsel %vm45_vm0, %v43_v7, 0.0 }
  0x97   :  { %47 = vadd.xlane.f32.xlu0 %v46_v8 }
 0x124   :  { %v48_v9 = vpop.xlane.xlu0 %47 }
 0x125   :  { %v49_v10 = vrot.slane %v48_v9, 4 }
 0x127   :  { %v50_v11 = vadd.f32 %v49_v10, %v48_v9 }
 0x129   :  { %v51_v12 = vrot.slane %v50_v11, 2 }
 0x12b   :  { %v52_v13 = vadd.f32 %v51_v12, %v50_v11 }
 0x12d   :  { %v53_v14 = vrot.slane %v52_v13, 1 }
 0x12f   :  { %v54_v15 = vadd.f32 %v53_v14, %v52_v13 }
 0x131   :  { %73 = vpush %v54_v15 }
 0x162   :  { %s74_s1 = spop %73 }
 0x163   :  { %58 = sst [smem:[#allocation5]] %s74_s1 }
 0x164   :  { %111 = shalt.err (!%p108_p10)
}
 0x165   :  { %s118_s6 = smov [#allocation5]  }
 0x166   :  { %66 = dma.smem_to_hbm %s118_s6, 16, %s172_s3, [#allocation4]  }
 0x167   :  { %114 = dma.done.wait [#allocation4], 16  }
 0x168   :  { %115 = vsyncadd [#allocation4], 4294967280 }
 0x169   :  { %70 = sfence }
 0x16a   :  { %71 = vsyncpa [#allocation3], 1 }
 0x16b   :  { %72 = vsyncpa [#allocation4], 1 }

</bundles_post_ra>
